<compile_context>
chip_gen: v7x
topology: tpu7x:2x2x1
jax: 0.10.0
libtpu: 0.0.40
codegen_flags: <defaults>
</compile_context>

<pallas_src>
import functools

import jax
import jax.numpy as jnp
from jax.experimental import pallas as pl
from jax.experimental.pallas import tpu as pltpu


def _factorvae_loss_kernel(y_ref,        # VMEM (S, N)
                           mu_y_ref,     # VMEM (S, N)
                           sigma_y_ref,  # VMEM (S, N)
                           z_ref,        # VMEM (1, 4K) = [mu1 | sigma1 | mu2 | sigma2]
                           out_ref,      # SMEM (1, 1) float32
                           *, gamma, k_dim, inv_count):
    f32 = jnp.float32

    # ---- loss1 = -mean(log probs), analytic log-prob (faithful to the torch
    #      normalizer sqrt(2*sigma*pi), i.e. -log p = d^2/(2 sigma^2)
    #      + 0.5*log(2*pi*sigma)) -------------------------------------------
    y = y_ref[...].astype(f32)
    mu = mu_y_ref[...].astype(f32)
    sigma = sigma_y_ref[...].astype(f32)

    inv_var = pl.reciprocal(sigma * sigma, approx=True)      # 1 / sigma^2
    d_y = y - mu
    neg_log_probs = (d_y * d_y) * (0.5 * inv_var) + 0.5 * jnp.log(
        (2.0 * jnp.pi) * sigma)
    loss1 = jnp.sum(neg_log_probs) * f32(inv_count)

    # ---- loss2 = KL(N(mu1, diag(s1)) || N(mu2, diag(s2))) ------------------
    z = z_ref[...].astype(f32)
    mu1 = z[:, 0 * k_dim:1 * k_dim]
    s1 = jnp.maximum(z[:, 1 * k_dim:2 * k_dim], 1e-6)         # torch.clip(min=1e-6)
    mu2 = z[:, 2 * k_dim:3 * k_dim]
    s2 = jnp.maximum(z[:, 3 * k_dim:4 * k_dim], 1e-6)

    inv_s2 = pl.reciprocal(s2, approx=True)
    trace_term = jnp.sum(s1 * inv_s2)                         # tr(S2^-1 S1)
    d = mu1 - mu2
    quad_term = jnp.sum(d * d * inv_s2)                       # (mu1-mu2) S2^-1 (mu1-mu2)^T
    log_det_ratio = jnp.sum(jnp.log(s2) - jnp.log(s1))        # log(det S2 / det S1)
    loss2 = 0.5 * (trace_term + quad_term - f32(k_dim) + log_det_ratio)

    out_ref[0, 0] = loss1 + f32(gamma) * loss2


def factorvae_loss(z_post, z_prior, y, y_rec, gamma=1.0):
    """Pallas implementation of FactorVAE_Loss.forward.

    z_post  = (mu_1, sigma_1), each (1, K)
    z_prior = (mu_2, sigma_2), each (1, K)
    y       = (S, N)
    y_rec   = (mu_y, sigma_y), each (S, N)
    returns a (1, 1) float32 loss (matching the torch module's output shape).
    """
    mu1, sigma1 = z_post
    mu2, sigma2 = z_prior
    mu_y, sigma_y = y_rec

    k_dim = mu1.shape[-1]
    # One lane-dense (1, 4K) input instead of four padded (1, K) tiles.
    z_pack = jnp.concatenate(
        [jnp.reshape(mu1, (1, k_dim)), jnp.reshape(sigma1, (1, k_dim)),
         jnp.reshape(mu2, (1, k_dim)), jnp.reshape(sigma2, (1, k_dim))],
        axis=-1)

    rows, cols = y.shape
    kernel = functools.partial(
        _factorvae_loss_kernel,
        gamma=float(gamma),
        k_dim=int(k_dim),
        inv_count=1.0 / float(rows * cols),
    )

    vmem = pl.BlockSpec(memory_space=pltpu.MemorySpace.VMEM)
    smem = pl.BlockSpec(memory_space=pltpu.MemorySpace.SMEM)

    return pl.pallas_call(
        kernel,
        out_shape=jax.ShapeDtypeStruct((1, 1), jnp.float32),
        in_specs=[vmem, vmem, vmem, vmem],
        out_specs=smem,
    )(y, mu_y, sigma_y, z_pack)


def _reference_loss(z_post, z_prior, y, y_rec, gamma=1.0):
    """Plain-JAX reference mirroring the torch module, for a sanity check."""
    mu_y, sigma_y = y_rec
    probs = jnp.exp(-jnp.square(y - mu_y) / (2 * jnp.square(sigma_y))) \
            / jnp.sqrt(2 * sigma_y * jnp.pi)
    loss1 = -jnp.mean(jnp.log(probs))

    mu1, s1 = z_post
    mu2, s2 = z_prior
    s1 = jnp.maximum(s1, 1e-6).reshape(-1)
    s2 = jnp.maximum(s2, 1e-6).reshape(-1)
    trace_term = jnp.sum(s1 / s2)
    diff = (mu1 - mu2).reshape(1, -1)
    quad = (diff @ jnp.diag(1.0 / s2) @ diff.T)[0, 0]
    log_det_ratio = jnp.sum(jnp.log(s2)) - jnp.sum(jnp.log(s1))
    loss2 = 0.5 * (trace_term + quad - mu1.shape[1] + log_det_ratio)
    return loss1 + gamma * loss2


if __name__ == "__main__":
    key = jax.random.PRNGKey(0)
    k1, k2, k3, k4, k5, k6, k7 = jax.random.split(key, 7)

    S, N = 8, 128   # stocks x horizon for y
    K = 32          # latent factor dim

    # Reconstruction target + predicted Gaussian (mu, sigma), sigma > 0.
    y       = jax.random.normal(k1, (S, N), dtype=jnp.float32)
    mu_y    = jax.random.normal(k2, (S, N), dtype=jnp.float32)
    sigma_y = jax.random.uniform(k3, (S, N), minval=0.5, maxval=1.5,
                                 dtype=jnp.float32)

    # Posterior / prior latent moments, shapes (1, K) as the module assumes.
    mu1    = jax.random.normal(k4, (1, K), dtype=jnp.float32)
    sigma1 = jax.random.uniform(k5, (1, K), minval=0.5, maxval=1.5,
                                dtype=jnp.float32)
    mu2    = jax.random.normal(k6, (1, K), dtype=jnp.float32)
    sigma2 = jax.random.uniform(k7, (1, K), minval=0.5, maxval=1.5,
                                dtype=jnp.float32)

    z_post = (mu1, sigma1)
    z_prior = (mu2, sigma2)
    y_rec = (mu_y, sigma_y)

    gamma = 1.0  # module default; the loss has no learned parameters.

    loss = factorvae_loss(z_post, z_prior, y, y_rec, gamma)
    loss = jax.block_until_ready(loss)

    ref = _reference_loss(z_post, z_prior, y, y_rec, gamma)
    assert loss.shape == (1, 1)
    # Slightly relaxed tolerance: kernel uses approx (EUP) reciprocals.
    assert jnp.allclose(loss[0, 0], ref, rtol=5e-3, atol=5e-3), (loss, ref)

    print("KERNEL_OK")
</pallas_src>

<mosaic_0001>
module attributes {stable_mosaic.version = 11 : i64} {
  func.func @_factorvae_loss_kernel(%arg0: memref<8x128xf32, #tpu.memory_space<vmem>>, %arg1: memref<8x128xf32, #tpu.memory_space<vmem>>, %arg2: memref<8x128xf32, #tpu.memory_space<vmem>>, %arg3: memref<1x128xf32, #tpu.memory_space<vmem>>, %arg4: memref<1x1xf32, #tpu.memory_space<smem>>) attributes {dimension_semantics = [], scalar_prefetch = 0 : i64, scratch_operands = 0 : i64, tpu.core_type = #tpu.core_type<tc>} {
    %c0 = arith.constant 0 : index
    %c0_0 = arith.constant 0 : index
    %0 = vector.load %arg0[%c0, %c0_0] : memref<8x128xf32, #tpu.memory_space<vmem>>, vector<8x128xf32>
    %c0_1 = arith.constant 0 : index
    %c0_2 = arith.constant 0 : index
    %1 = vector.load %arg1[%c0_1, %c0_2] : memref<8x128xf32, #tpu.memory_space<vmem>>, vector<8x128xf32>
    %c0_3 = arith.constant 0 : index
    %c0_4 = arith.constant 0 : index
    %2 = vector.load %arg2[%c0_3, %c0_4] : memref<8x128xf32, #tpu.memory_space<vmem>>, vector<8x128xf32>
    %3 = arith.mulf %2, %2 : vector<8x128xf32>
    %4 = tpu.reciprocal %3 {approx = true} : vector<8x128xf32> -> vector<8x128xf32>
    %5 = arith.subf %0, %1 : vector<8x128xf32>
    %6 = arith.mulf %5, %5 : vector<8x128xf32>
    %cst = arith.constant 5.000000e-01 : f32
    %7 = vector.broadcast %cst : f32 to vector<8x128xf32>
    %8 = arith.mulf %7, %4 : vector<8x128xf32>
    %9 = arith.mulf %6, %8 : vector<8x128xf32>
    %cst_5 = arith.constant 6.28318548 : f32
    %10 = vector.broadcast %cst_5 : f32 to vector<8x128xf32>
    %11 = arith.mulf %10, %2 : vector<8x128xf32>
    %12 = math.log %11 : vector<8x128xf32>
    %cst_6 = arith.constant 5.000000e-01 : f32
    %13 = vector.broadcast %cst_6 : f32 to vector<8x128xf32>
    %14 = arith.mulf %13, %12 : vector<8x128xf32>
    %15 = arith.addf %9, %14 : vector<8x128xf32>
    %16 = vector.shape_cast %15 : vector<8x128xf32> to vector<1x8x128xf32>
    %cst_7 = arith.constant dense<0.000000e+00> : vector<1xf32>
    %17 = vector.multi_reduction <add>, %16, %cst_7 [1, 2] : vector<1x8x128xf32> to vector<1xf32>
    %18 = vector.shape_cast %17 : vector<1xf32> to vector<1x1x1xf32>
    %19 = vector.extract %18[0, 0, 0] : f32 from vector<1x1x1xf32>
    %cst_8 = arith.constant 9.765625E-4 : f32
    %20 = arith.mulf %19, %cst_8 : f32
    %c0_9 = arith.constant 0 : index
    %c0_10 = arith.constant 0 : index
    %21 = vector.load %arg3[%c0_9, %c0_10] : memref<1x128xf32, #tpu.memory_space<vmem>>, vector<1x128xf32>
    %22 = vector.extract_strided_slice %21 {offsets = [0, 0], sizes = [1, 32], strides = [1, 1]} : vector<1x128xf32> to vector<1x32xf32>
    %23 = vector.extract_strided_slice %21 {offsets = [0, 32], sizes = [1, 32], strides = [1, 1]} : vector<1x128xf32> to vector<1x32xf32>
    %cst_11 = arith.constant 9.99999997E-7 : f32
    %24 = vector.broadcast %cst_11 : f32 to vector<1x32xf32>
    %25 = arith.maximumf %23, %24 : vector<1x32xf32>
    %26 = vector.extract_strided_slice %21 {offsets = [0, 64], sizes = [1, 32], strides = [1, 1]} : vector<1x128xf32> to vector<1x32xf32>
    %27 = vector.extract_strided_slice %21 {offsets = [0, 96], sizes = [1, 32], strides = [1, 1]} : vector<1x128xf32> to vector<1x32xf32>
    %cst_12 = arith.constant 9.99999997E-7 : f32
    %28 = vector.broadcast %cst_12 : f32 to vector<1x32xf32>
    %29 = arith.maximumf %27, %28 : vector<1x32xf32>
    %30 = tpu.reciprocal %29 {approx = true} : vector<1x32xf32> -> vector<1x32xf32>
    %31 = arith.mulf %25, %30 : vector<1x32xf32>
    %32 = vector.shape_cast %31 : vector<1x32xf32> to vector<1x1x32xf32>
    %cst_13 = arith.constant dense<0.000000e+00> : vector<1xf32>
    %33 = vector.multi_reduction <add>, %32, %cst_13 [1, 2] : vector<1x1x32xf32> to vector<1xf32>
    %34 = vector.shape_cast %33 : vector<1xf32> to vector<1x1x1xf32>
    %35 = vector.extract %34[0, 0, 0] : f32 from vector<1x1x1xf32>
    %36 = arith.subf %22, %26 : vector<1x32xf32>
    %37 = arith.mulf %36, %36 : vector<1x32xf32>
    %38 = arith.mulf %37, %30 : vector<1x32xf32>
    %39 = vector.shape_cast %38 : vector<1x32xf32> to vector<1x1x32xf32>
    %cst_14 = arith.constant dense<0.000000e+00> : vector<1xf32>
    %40 = vector.multi_reduction <add>, %39, %cst_14 [1, 2] : vector<1x1x32xf32> to vector<1xf32>
    %41 = vector.shape_cast %40 : vector<1xf32> to vector<1x1x1xf32>
    %42 = vector.extract %41[0, 0, 0] : f32 from vector<1x1x1xf32>
    %43 = math.log %29 : vector<1x32xf32>
    %44 = math.log %25 : vector<1x32xf32>
    %45 = arith.subf %43, %44 : vector<1x32xf32>
    %46 = vector.shape_cast %45 : vector<1x32xf32> to vector<1x1x32xf32>
    %cst_15 = arith.constant dense<0.000000e+00> : vector<1xf32>
    %47 = vector.multi_reduction <add>, %46, %cst_15 [1, 2] : vector<1x1x32xf32> to vector<1xf32>
    %48 = vector.shape_cast %47 : vector<1xf32> to vector<1x1x1xf32>
    %49 = vector.extract %48[0, 0, 0] : f32 from vector<1x1x1xf32>
    %50 = arith.addf %35, %42 : f32
    %cst_16 = arith.constant 3.200000e+01 : f32
    %51 = arith.subf %50, %cst_16 : f32
    %52 = arith.addf %51, %49 : f32
    %cst_17 = arith.constant 5.000000e-01 : f32
    %53 = arith.mulf %cst_17, %52 : f32
    %cst_18 = arith.constant 1.000000e+00 : f32
    %54 = arith.mulf %cst_18, %53 : f32
    %55 = arith.addf %20, %54 : f32
    %c0_19 = arith.constant 0 : index
    %c0_20 = arith.constant 0 : index
    %56 = memref.load %arg4[%c0_19, %c0_20] : memref<1x1xf32, #tpu.memory_space<smem>>
    memref.store %55, %arg4[%c0_19, %c0_20] : memref<1x1xf32, #tpu.memory_space<smem>>
    return
  }
}

</mosaic_0001>

<bundles_post_ra>
// kernel: tpu_custom_call.1
= control target key start
LH: loop header
LB: loop body
LE: loop exit
PB: predicated region body
PF: predicated region fallthrough
CT: control target
= control target key end

     0   :  { %9 = vsyncpa [#allocation3], 0  ;;  %s360_s0 = inlined_call_operand.hbm [shape: f32[8,128], index: 0, kind: input, shape index: {}]   ;;  %s361_s1 = inlined_call_operand.hbm [shape: f32[8,128], index: 1, kind: input, shape index: {}]   ;;  %s362_s2 = inlined_call_operand.hbm [shape: f32[8,128], index: 2, kind: input, shape index: {}]   ;;  %s363_s3 = inlined_call_operand.vmem [shape: f32[1,128], index: 3, kind: input, shape index: {}]   ;;  %s364_s4 = inlined_call_operand.hbm [shape: f32[1,1], index: 4, kind: output, shape index: {}]  }
   0x1   :  { %10 = vsyncpa [#allocation6], 0 }
   0x2   :  { %11 = vsyncpa [#allocation4], 0  ;;  %s277_s15 = smov [#allocation5]   ;;  %s278_s17 = smov [#allocation2]  }
   0x3   :  { %s28_s16 = sshll.u32 %s277_s15, 4  ;;  %s18_s18 = sshll.u32 %s278_s17, 4  ;;  %s29_s16 = int_to_ptr.vmem [resolvable:$true] %s28_s16  ;;  %s19_s18 = int_to_ptr.vmem [resolvable:$true] %s18_s18 }
   0x4   :  { %s195_s21 = scalar_lea.hbm %s361_s1, 128 }
   0x5   :  { %p196_p0 = scmp.ne.s32.totalorder %s361_s1, %s195_s21  ;;  %p199_p1 = scmp.lt.u32.totalorder %s195_s21, %s361_s1 }
   0x7   :  { %p201_p2 = pnand %p199_p1, %p196_p0 }
   0x9   :  { %204 = shalt.err (!%p201_p2)
}
   0xa   :  { %s205_s26 = scalar_lea.vmem %s29_s16, 128  ;;  %p210_p4 = scmp.lt.s32.totalorder %s29_s16, %s29_s16 }
   0xb   :  { %p206_p3 = scmp.ne.s32.totalorder %s29_s16, %s205_s26  ;;  %p211_p5 = scmp.lt.s32.totalorder %s205_s26, %s205_s26 }
   0xd   :  { %p212_p6 = por %p211_p5, %p210_p4 }
   0xf   :  { %p213_p7 = pnand %p212_p6, %p206_p3 }
  0x11   :  { %216 = shalt.err (!%p213_p7)
}
  0x12   :  { %31 = dma.hbm_to_vmem [thread:$0]  %s361_s1, 128, %s29_s16, [#allocation6]  }
  0x13   :  { %s217_s5 = scalar_lea.hbm %s360_s0, 128 }
  0x14   :  { %p218_p8 = scmp.ne.s32.totalorder %s360_s0, %s217_s5  ;;  %p221_p9 = scmp.lt.u32.totalorder %s217_s5, %s360_s0 }
  0x16   :  { %p223_p10 = pnand %p221_p9, %p218_p8 }
  0x18   :  { %226 = shalt.err (!%p223_p10)
}
  0x19   :  { %s227_s10 = scalar_lea.vmem %s19_s18, 128  ;;  %p232_p12 = scmp.lt.s32.totalorder %s19_s18, %s19_s18 }
  0x1a   :  { %p228_p11 = scmp.ne.s32.totalorder %s19_s18, %s227_s10  ;;  %p233_p13 = scmp.lt.s32.totalorder %s227_s10, %s227_s10 }
  0x1c   :  { %p234_p0 = por %p233_p13, %p232_p12 }
  0x1e   :  { %p235_p1 = pnand %p234_p0, %p228_p11 }
  0x20   :  { %238 = shalt.err (!%p235_p1)
}
  0x21   :  { %21 = dma.hbm_to_vmem [thread:$0]  %s360_s0, 128, %s19_s18, [#allocation3]  }
  0x22   :  { %s279_s12 = smov [#allocation7]   ;;  %s239_s16 = scalar_lea.hbm %s362_s2, 128 }
  0x23   :  { %s38_s13 = sshll.u32 %s279_s12, 4  ;;  %p240_p2 = scmp.ne.s32.totalorder %s362_s2, %s239_s16  ;;  %s39_s13 = int_to_ptr.vmem [resolvable:$true] %s38_s13 }
  0x24   :  { %p243_p3 = scmp.lt.u32.totalorder %s239_s16, %s362_s2 }
  0x26   :  { %p245_p4 = pnand %p243_p3, %p240_p2 }
  0x28   :  { %248 = shalt.err (!%p245_p4)
}
  0x29   :  { %s249_s22 = scalar_lea.vmem %s39_s13, 128  ;;  %p254_p6 = scmp.lt.s32.totalorder %s39_s13, %s39_s13 }
  0x2a   :  { %p250_p5 = scmp.ne.s32.totalorder %s39_s13, %s249_s22  ;;  %p255_p7 = scmp.lt.s32.totalorder %s249_s22, %s249_s22 }
  0x2c   :  { %p256_p8 = por %p255_p7, %p254_p6 }
  0x2e   :  { %p257_p9 = pnand %p256_p8, %p250_p5 }
  0x30   :  { %260 = shalt.err (!%p257_p9)
}
  0x31   :  { %41 = dma.hbm_to_vmem [thread:$0]  %s362_s2, 128, %s39_s13, [#allocation6]  }
  0x32   :  { %271 = dma.done.wait [#allocation3], 128  }
  0x33   :  { %272 = vsyncadd [#allocation3], 4294967168 }
  0x34   :  { %273 = dma.done.wait [#allocation6], 256  }
  0x35   :  { %274 = vsyncadd [#allocation6], 4294967040  ;;  %v77_v0 = vld [vmem:[%s363_s3] sm:$0x1]  ;;  %s280_s25 = smov 64   ;;  %s281_s26 = smov 32   ;;  %v86_v5 = vlaneseq }
  0x36   :  { %v78_v1 = vmax.f32 %v77_v0, 1e-06  ;;  %105 = vrot.lane.b32.xlu1 %v77_v0, %s280_s25  ;;  %v55_v11 = vld [vmem:[#allocation7] sm:$0xff]  ;;  %s282_s2 = smov 96   ;;  %v53_v17 = vld [vmem:[#allocation2] sm:$0xff]  ;;  %v54_v18 = vld [vmem:[#allocation5] sm:$0xff] }
  0x37   :  { %v87_v6 = vshrl.u32 %v86_v5, 7  ;;  %v56_v14 = vmul.f32 %v55_v11, %v55_v11  ;;  %v62_v16 = vmul.f32 6.2831855, %v55_v11  ;;  %v58_v20 = vsub.f32 %v53_v17, %v54_v18  ;;  %s261_s11 = scalar_lea.hbm %s364_s4, 16 }
  0x38   :  { %187 = vrcp.f32 %v78_v1  ;;  %vm93_vm0 = vcmask 253952   ;;  %p262_p10 = scmp.ne.s32.totalorder %s364_s4, %s261_s11  ;;  %p265_p11 = scmp.lt.u32.totalorder %s261_s11, %s364_s4 }
  0x39   :  { %189 = vlog2.f32 %v78_v1  ;;  %v88_v7 = vsub.s32 0, %v87_v6  ;;  %v59_v23 = vmul.f32 %v58_v20, %v58_v20 }
  0x3a   :  { %191 = vrcp.f32 %v56_v14  ;;  %p267_p12 = pnand %p265_p11, %p262_p10 }
  0x3b   :  { %193 = vlog2.f32 %v62_v16 }
  0x42   :  { %v188_v2 = vpop.eup %187 }
  0x43   :  { %v190_v3 = vpop.eup %189  ;;  %81 = vrot.lane.b32.xlu0 %v188_v2, %s280_s25  ;;  %110 = vrot.lane.b32.xlu1 %v188_v2, %s281_s26 }
  0x44   :  { %v125_v4 = vmul.f32 0.6931472, %v190_v3  ;;  %v192_v19 = vpop.eup %191 }
  0x45   :  { %v194_v21 = vpop.eup %193  ;;  %v60_v24 = vmul.f32 0.5, %v192_v19 }
  0x46   :  { %v64_v25 = vmul.f32 0.6931472, %v194_v21 }
  0x47   :  { %127 = vrot.lane.b32.xlu0 %v125_v4, %s280_s25  ;;  %v61_v27 = vmul.f32 %v60_v24, %v59_v23 }
  0x48   :  { %v65_v28 = vmul.f32 0.5, %v64_v25 }
  0x4a   :  { %v66_v31 = vadd.f32 %v65_v28, %v61_v27 }
  0xa8   :  { %v106_v22 = vpop.permute.xlu1 %105 }
  0xa9   :  { %v108_v26 = vsub.f32 %v77_v0, %v106_v22 }
  0xab   :  { %v109_v29 = vmul.f32 %v108_v26, %v108_v26 }
  0xb5   :  { %v82_v8 = vpop.permute.xlu0 %81  ;;  %v111_v30 = vpop.permute.xlu1 %110 }
  0xb6   :  { %v84_v9 = vmul.f32 %v82_v8, %v78_v1  ;;  %v113_v32 = vmul.f32 %v111_v30, %v109_v29 }
  0xb8   :  { %v89_v10 = vrot.slane %v84_v9, %v88_v7  ;;  %v114_v33 = vsel %vm93_vm0, %v113_v32, 0.0 }
  0xb9   :  { %v128_v12 = vpop.permute.xlu0 %127 }
  0xba   :  { %v130_v13 = vsub.f32 %v125_v4, %v128_v12  ;;  %90 = vrot.lane.b32.xlu0 %v89_v10, %s282_s2 }
  0xbc   :  { %v135_v15 = vrot.slane %v130_v13, %v88_v7 }
  0xbe   :  { %136 = vrot.lane.b32.xlu1 %v135_v15, %s281_s26 }
  0xd9   :  { %67 = vadd.xlane.f32.xlu0 %v66_v31 }
  0xdd   :  { %115 = vadd.xlane.f32.xlu0 %v114_v33 }
 0x12c   :  { %v91_v34 = vpop.permute.xlu0 %90 }
 0x12d   :  { %v94_v35 = vsel %vm93_vm0, %v91_v34, 0.0 }
 0x12e   :  { %95 = vadd.xlane.f32.xlu1 %v94_v35 }
 0x130   :  { %v137_v36 = vpop.permute.xlu1 %136 }
 0x131   :  { %v139_v37 = vsel %vm93_vm0, %v137_v36, 0.0 }
 0x132   :  { %140 = vadd.xlane.f32.xlu0 %v139_v37 }
 0x166   :  { %v68_v38 = vpop.xlane.xlu0 %67 }
 0x167   :  { %v69_v39 = vrot.slane %v68_v38, 4 }
 0x169   :  { %v70_v40 = vadd.f32 %v69_v39, %v68_v38 }
 0x16a   :  { %v116_v45 = vpop.xlane.xlu0 %115 }
 0x16b   :  { %v71_v41 = vrot.slane %v70_v40, 2  ;;  %v117_v46 = vrot.slane %v116_v45, 4 }
 0x16d   :  { %v72_v42 = vadd.f32 %v71_v41, %v70_v40  ;;  %v118_v47 = vadd.f32 %v117_v46, %v116_v45 }
 0x16f   :  { %v73_v43 = vrot.slane %v72_v42, 1  ;;  %v119_v48 = vrot.slane %v118_v47, 2 }
 0x171   :  { %v74_v44 = vadd.f32 %v73_v43, %v72_v42  ;;  %v120_v53 = vadd.f32 %v119_v48, %v118_v47 }
 0x173   :  { %172 = vpush %v74_v44  ;;  %v121_v58 = vrot.slane %v120_v53, 1 }
 0x175   :  { %v122_v63 = vadd.f32 %v121_v58, %v120_v53 }
 0x1a4   :  { %s173_s3 = spop %172 }
 0x1a5   :  { %s76_s7 = smul.f32 0.0009765625, %s173_s3 }
 0x1bb   :  { %v96_v49 = vpop.xlane.xlu1 %95 }
 0x1bc   :  { %v97_v50 = vrot.slane %v96_v49, 4 }
 0x1be   :  { %v98_v51 = vadd.f32 %v97_v50, %v96_v49 }
 0x1bf   :  { %v141_v52 = vpop.xlane.xlu0 %140 }
 0x1c0   :  { %v99_v54 = vrot.slane %v98_v51, 2  ;;  %v142_v55 = vrot.slane %v141_v52, 4 }
 0x1c2   :  { %v100_v56 = vadd.f32 %v99_v54, %v98_v51  ;;  %v143_v57 = vadd.f32 %v142_v55, %v141_v52 }
 0x1c4   :  { %v144_v59 = vrot.slane %v143_v57, 2  ;;  %v101_v60 = vrot.slane %v100_v56, 1 }
 0x1c6   :  { %v145_v61 = vadd.f32 %v144_v59, %v143_v57  ;;  %v102_v62 = vadd.f32 %v101_v60, %v100_v56 }
 0x1c8   :  { %174 = vpush %v102_v62  ;;  %v146_v0 = vrot.slane %v145_v61, 1 }
 0x1c9   :  { %176 = vpush %v122_v63 }
 0x1ca   :  { %v147_v1 = vadd.f32 %v146_v0, %v145_v61 }
 0x1cc   :  { %178 = vpush %v147_v1 }
 0x1f9   :  { %s175_s27 = spop %174 }
 0x1fa   :  { %s177_s28 = spop %176 }
 0x1fb   :  { %s149_s29 = sadd.f32 %s177_s28, %s175_s27 }
 0x1fd   :  { %s171_s30 = sadd.f32 -32.0, %s149_s29  ;;  %s179_s5 = spop %178 }
 0x1ff   :  { %s151_s6 = sadd.f32 %s179_s5, %s171_s30 }
 0x201   :  { %s152_s8 = smul.f32 0.5, %s151_s6 }
 0x203   :  { %s153_s9 = sadd.f32 %s152_s8, %s76_s7 }
 0x205   :  { %155 = sst [smem:[#allocation8]] %s153_s9 }
 0x206   :  { %270 = shalt.err (!%p267_p12)
}
 0x207   :  { %s283_s16 = smov [#allocation8]  }
 0x208   :  { %163 = dma.smem_to_hbm %s283_s16, 16, %s364_s4, [#allocation4]  }
 0x209   :  { %275 = dma.done.wait [#allocation4], 16  }
 0x20a   :  { %276 = vsyncadd [#allocation4], 4294967280 }
 0x20b   :  { %167 = sfence }
 0x20c   :  { %168 = vsyncpa [#allocation3], 1 }
 0x20d   :  { %169 = vsyncpa [#allocation6], 1 }
 0x20e   :  { %170 = vsyncpa [#allocation4], 1 }

</bundles_post_ra>
